<compile_context>
chip_gen: v7x
topology: tpu7x:2x2x1
jax: 0.10.0
libtpu: 0.0.40
codegen_flags: <defaults>
</compile_context>

<pallas_src>
import numpy as np

import jax
import jax.numpy as jnp
from jax.experimental import pallas as pl
from jax.experimental.pallas import tpu as pltpu


def _decode_kernel(rowp_ref, gxy_ref, x_ref, out_ref):
    """Decode one lane-dense (A*attrs, hw_tile) tile.

    rowp_ref : (A*attrs, 4) f32 per-row params [scale, is_wh, gx_coef, gy_coef]
               scale = [stride_w, stride_h, aw, ah, 1, ...] per anchor.
    gxy_ref  : (2, hw_tile) f32 [grid_x ; grid_y] for this spatial tile.
    x_ref    : (A*attrs, hw_tile) raw network outputs (any float dtype).
    out_ref  : (A*attrs, hw_tile) decoded output (lane-dense).
    """
    x = x_ref[...].astype(jnp.float32)              # upcast in-register
    # sigmoid via tanh: 1 EUP op/elem instead of exp+recip (keeps v7x HBM-bound)
    sig = 0.5 * jnp.tanh(0.5 * x) + 0.5
    expx = jnp.exp(x)                               # the only other EUP op

    scale = rowp_ref[:, 0:1]                        # (AC, 1)
    is_wh = rowp_ref[:, 1:2] > 0.5                  # rows 2,3 of each anchor
    gx_c = rowp_ref[:, 2:3]                         # 1.0 on row 0, else 0.0
    gy_c = rowp_ref[:, 3:4]                         # 1.0 on row 1, else 0.0

    addend = gx_c * gxy_ref[0:1, :] + gy_c * gxy_ref[1:2, :]    # (AC, T)
    # rows 0/1: (sigmoid + grid) * stride ; rows 2/3: exp * anchor ;
    # rows >= 4: sigmoid * 1.  jnp.where selects, so an overflowed exp on an
    # unselected row never reaches the output.
    dec = (jnp.where(is_wh, expx, sig) + addend) * scale
    out_ref[...] = dec.astype(out_ref.dtype)


def _pick_hw_tile(hw, n_rows, batch, in_itemsize, out_itemsize,
                  target_block_bytes=4 << 20, cap=8192):
    """Lane-dense hw tile: multiple of 128 (or full extent), VMEM-budgeted,
    and keeping >=2 parallel grid steps when possible (v7x has 2 TCs)."""
    if hw <= 128:
        return hw
    tile = min(cap, (hw // 128) * 128)
    per_lane_bytes = n_rows * (in_itemsize + out_itemsize)
    max_by_vmem = max(128, (target_block_bytes // per_lane_bytes) // 128 * 128)
    tile = min(tile, max_by_vmem)
    if batch * pl.cdiv(hw, tile) < 2:
        # single-step grid would idle one v7x TensorCore; split the hw axis.
        tile = max(128, min(tile, ((hw // 2) // 128) * 128 or 128))
    return tile


def _pallas_decode(x, rowp, gxy, out_dtype):
    """x: (B, A*attrs, HW); rowp: (A*attrs, 4); gxy: (2, HW) -> (B, A*attrs, HW)."""
    B, AC, HW = x.shape
    out_itemsize = jnp.dtype(out_dtype).itemsize
    hw_tile = _pick_hw_tile(HW, AC, B, x.dtype.itemsize, out_itemsize)
    n_hw = pl.cdiv(HW, hw_tile)

    # hw axis OUTERMOST so the gxy block index is constant across the inner B
    # steps (Pallas skips the re-copy) -> gxy is DMA'd only n_hw times.
    grid = (n_hw, B)
    in_specs = [
        # tiny per-row multipliers / masks, DMA'd once
        pl.BlockSpec((AC, 4), lambda t, b: (0, 0)),
        # precomputed grid offsets for this spatial tile
        pl.BlockSpec((2, hw_tile), lambda t, b: (0, t)),
        # raw outputs, lane-dense, A folded into the block
        pl.BlockSpec((None, AC, hw_tile), lambda t, b: (b, 0, t)),
    ]
    out_specs = pl.BlockSpec((None, AC, hw_tile), lambda t, b: (b, 0, t))
    out_shape = jax.ShapeDtypeStruct((B, AC, HW), out_dtype)

    elems = B * AC * HW
    cost = pl.CostEstimate(
        flops=6 * elems,
        transcendentals=2 * elems,
        bytes_accessed=elems * (x.dtype.itemsize + out_itemsize)
                       + rowp.size * 4 + 2 * HW * 4,
    )

    return pl.pallas_call(
        _decode_kernel,
        out_shape=out_shape,
        grid_spec=pltpu.PrefetchScalarGridSpec(
            num_scalar_prefetch=0,
            grid=grid,
            in_specs=in_specs,
            out_specs=out_specs,
        ),
        compiler_params=pltpu.CompilerParams(
            dimension_semantics=("parallel", "parallel")),
        cost_estimate=cost,
    )(rowp, gxy, x)


def yolo_head_forward(x_nchw, anchors, num_classes, image_size=(416, 416),
                      out_dtype=jnp.float32):
    """Pallas implementation of YOLOHead.forward with targets=None.

    Returns (output, loss): output (B, A*H*W, 5+num_classes); loss is None.
    Fully jittable (no host sync, no try/except path selection).
    """
    B, C_in, H, W = x_nchw.shape
    anchors = jnp.asarray(anchors, jnp.float32)
    A = anchors.shape[0]
    attrs = 5 + num_classes
    AC = A * attrs
    assert C_in == AC, "channel dim must equal num_anchors*(5+classes)"
    stride_h = float(image_size[0]) / H
    stride_w = float(image_size[1]) / W
    HW = H * W

    # Free view: (B, A*attrs, H, W) -> (B, A*attrs, HW). No dtype cast here; the
    # kernel upcasts in-register.
    x = x_nchw.reshape(B, AC, HW)

    # Per-row parameters (A*attrs, 4): [scale, is_wh, gx_coef, gy_coef].
    j = np.arange(attrs)
    scale_np = np.ones((A, attrs), np.float32)
    scale_np[:, 0] = stride_w
    scale_np[:, 1] = stride_h
    scale = jnp.asarray(scale_np)
    scale = scale.at[:, 2].set(anchors[:, 0]).at[:, 3].set(anchors[:, 1])
    scale = scale.reshape(AC)
    is_wh = jnp.asarray(np.tile(((j >= 2) & (j <= 3)).astype(np.float32), A))
    gx_c = jnp.asarray(np.tile((j == 0).astype(np.float32), A))
    gy_c = jnp.asarray(np.tile((j == 1).astype(np.float32), A))
    rowp = jnp.stack([scale, is_wh, gx_c, gy_c], axis=1)        # (AC, 4)

    # Tiny precomputed grid offsets (static): row 0 = x-index, row 1 = y-index.
    gy_np, gx_np = np.divmod(np.arange(HW, dtype=np.int64), W)
    gxy = jnp.asarray(np.stack([gx_np, gy_np], axis=0).astype(np.float32))

    out = _pallas_decode(x, rowp, gxy, out_dtype)               # (B, AC, HW)
    # attrs-minor final layout via one XLA transpose: the kernel write side
    # stays lane-dense / full bandwidth (review option (b)).
    output = out.reshape(B, A, attrs, HW).transpose(0, 1, 3, 2)
    output = output.reshape(B, A * HW, attrs)
    return output, None


def _reference_forward(x_nchw, anchors, num_classes, image_size=(416, 416)):
    """Pure-jnp reference mirroring the PyTorch forward (targets=None)."""
    B, _, H, W = x_nchw.shape
    A = anchors.shape[0]
    attrs = 5 + num_classes
    stride_h = image_size[0] / H
    stride_w = image_size[1] / W
    pred = x_nchw.reshape(B, A, attrs, H, W).transpose(0, 1, 3, 4, 2)
    cx = jax.nn.sigmoid(pred[..., 0])
    cy = jax.nn.sigmoid(pred[..., 1])
    bw = pred[..., 2]
    bh = pred[..., 3]
    conf = jax.nn.sigmoid(pred[..., 4])
    cls = jax.nn.sigmoid(pred[..., 5:])
    gx = jnp.arange(W, dtype=jnp.float32)[None, None, None, :]
    gy = jnp.arange(H, dtype=jnp.float32)[None, None, :, None]
    aw = anchors[:, 0][None, :, None, None]
    ah = anchors[:, 1][None, :, None, None]
    pb = jnp.stack([(cx + gx) * stride_w,
                    (cy + gy) * stride_h,
                    jnp.exp(bw) * aw,
                    jnp.exp(bh) * ah], axis=-1)
    return jnp.concatenate(
        [pb.reshape(B, -1, 4),
         conf.reshape(B, -1, 1),
         cls.reshape(B, -1, num_classes)], axis=-1)


if __name__ == "__main__":
    # Small, forward-consistent shapes: B=2, A=3 anchors, 3 classes
    # => bbox_attrs = 8, channels = 3*8 = 24, spatial 16x16.
    B, A, num_classes, H, W = 2, 3, 3, 16, 16
    attrs = 5 + num_classes
    image_size = (416, 416)

    key = jax.random.PRNGKey(0)
    x = jax.random.normal(key, (B, A * attrs, H, W), dtype=jnp.float32)
    anchors = jnp.array([[10.0, 13.0], [16.0, 30.0], [33.0, 23.0]],
                        dtype=jnp.float32)

    fwd = jax.jit(yolo_head_forward, static_argnums=(2, 3))
    out, loss = fwd(x, anchors, num_classes, image_size)
    out = jax.block_until_ready(out)

    ref = _reference_forward(x, anchors, num_classes, image_size)
    assert out.shape == (B, A * H * W, attrs)
    assert loss is None
    assert jnp.allclose(out, ref, atol=1e-4, rtol=1e-4), "mismatch vs reference"

    print("KERNEL_OK")
</pallas_src>

<mosaic_0001>
module attributes {stable_mosaic.version = 11 : i64} {
  func.func @_decode_kernel(%arg0: i32, %arg1: i32, %arg2: memref<24x4xf32, #tpu.memory_space<vmem>>, %arg3: memref<2x256xf32, #tpu.memory_space<vmem>>, %arg4: memref<1x24x256xf32, #tpu.memory_space<vmem>>, %arg5: memref<1x24x256xf32, #tpu.memory_space<vmem>>) attributes {dimension_semantics = [#tpu.dimension_semantics<parallel>, #tpu.dimension_semantics<parallel>], iteration_bounds = array<i64: 1, 2>, scalar_prefetch = 0 : i64, scratch_operands = 0 : i64, tpu.core_type = #tpu.core_type<tc>, window_params = [{pipeline_mode = #tpu.pipeline_mode<synchronous>, transform_indices = @transform_0, window_bounds = array<i64: 24, 4>}, {transform_indices = @transform_1, window_bounds = array<i64: 2, 256>}, {transform_indices = @transform_2, window_bounds = array<i64: 1, 24, 256>}, {transform_indices = @transform_3, window_bounds = array<i64: 1, 24, 256>}]} {
    %c0 = arith.constant 0 : index
    %c0_0 = arith.constant 0 : index
    %c0_1 = arith.constant 0 : index
    %0 = vector.load %arg4[%c0, %c0_0, %c0_1] : memref<1x24x256xf32, #tpu.memory_space<vmem>>, vector<1x24x256xf32>
    %1 = vector.shape_cast %0 : vector<1x24x256xf32> to vector<24x256xf32>
    %cst = arith.constant 5.000000e-01 : f32
    %2 = vector.broadcast %cst : f32 to vector<24x256xf32>
    %3 = arith.mulf %2, %1 : vector<24x256xf32>
    %4 = math.tanh %3 : vector<24x256xf32>
    %cst_2 = arith.constant 5.000000e-01 : f32
    %5 = vector.broadcast %cst_2 : f32 to vector<24x256xf32>
    %6 = arith.mulf %5, %4 : vector<24x256xf32>
    %cst_3 = arith.constant 5.000000e-01 : f32
    %7 = vector.broadcast %cst_3 : f32 to vector<24x256xf32>
    %8 = arith.addf %6, %7 : vector<24x256xf32>
    %9 = math.exp %1 : vector<24x256xf32>
    %c0_4 = arith.constant 0 : index
    %c0_5 = arith.constant 0 : index
    %10 = vector.load %arg2[%c0_4, %c0_5] : memref<24x4xf32, #tpu.memory_space<vmem>>, vector<24x1xf32>
    %c0_6 = arith.constant 0 : index
    %c1 = arith.constant 1 : index
    %11 = vector.load %arg2[%c0_6, %c1] : memref<24x4xf32, #tpu.memory_space<vmem>>, vector<24x1xf32>
    %cst_7 = arith.constant 5.000000e-01 : f32
    %12 = vector.broadcast %cst_7 : f32 to vector<24x1xf32>
    %13 = arith.cmpf ogt, %11, %12 : vector<24x1xf32>
    %c0_8 = arith.constant 0 : index
    %c2 = arith.constant 2 : index
    %14 = vector.load %arg2[%c0_8, %c2] : memref<24x4xf32, #tpu.memory_space<vmem>>, vector<24x1xf32>
    %c0_9 = arith.constant 0 : index
    %c3 = arith.constant 3 : index
    %15 = vector.load %arg2[%c0_9, %c3] : memref<24x4xf32, #tpu.memory_space<vmem>>, vector<24x1xf32>
    %c0_10 = arith.constant 0 : index
    %c0_11 = arith.constant 0 : index
    %16 = vector.load %arg3[%c0_10, %c0_11] : memref<2x256xf32, #tpu.memory_space<vmem>>, vector<1x256xf32>
    %17 = vector.broadcast %14 : vector<24x1xf32> to vector<24x256xf32>
    %18 = vector.broadcast %16 : vector<1x256xf32> to vector<24x256xf32>
    %19 = arith.mulf %17, %18 : vector<24x256xf32>
    %c1_12 = arith.constant 1 : index
    %c0_13 = arith.constant 0 : index
    %20 = vector.load %arg3[%c1_12, %c0_13] : memref<2x256xf32, #tpu.memory_space<vmem>>, vector<1x256xf32>
    %21 = vector.broadcast %15 : vector<24x1xf32> to vector<24x256xf32>
    %22 = vector.broadcast %20 : vector<1x256xf32> to vector<24x256xf32>
    %23 = arith.mulf %21, %22 : vector<24x256xf32>
    %24 = arith.addf %19, %23 : vector<24x256xf32>
    %25 = vector.shape_cast %13 : vector<24x1xi1> to vector<24x1xi1>
    %26 = vector.broadcast %25 : vector<24x1xi1> to vector<24x256xi1>
    %27 = arith.select %26, %9, %8 : vector<24x256xi1>, vector<24x256xf32>
    %28 = arith.addf %27, %24 : vector<24x256xf32>
    %29 = vector.broadcast %10 : vector<24x1xf32> to vector<24x256xf32>
    %30 = arith.mulf %28, %29 : vector<24x256xf32>
    %c0_14 = arith.constant 0 : index
    %c0_15 = arith.constant 0 : index
    %c0_16 = arith.constant 0 : index
    %31 = vector.load %arg5[%c0_14, %c0_15, %c0_16] : memref<1x24x256xf32, #tpu.memory_space<vmem>>, vector<1x24x256xf32>
    %32 = vector.shape_cast %31 : vector<1x24x256xf32> to vector<24x256xf32>
    %33 = vector.shape_cast %30 : vector<24x256xf32> to vector<1x24x256xf32>
    tpu.vector_store %arg5[%c0_14, %c0_15, %c0_16], %33 {strides = array<i32>} : memref<1x24x256xf32, #tpu.memory_space<vmem>>, vector<1x24x256xf32>,
    return
  }
  func.func @transform_0(%arg0: i32, %arg1: i32) -> (i32, i32) {
    %c0_i32 = arith.constant 0 : i32
    %c0_i32_0 = arith.constant 0 : i32
    %c0_i32_1 = arith.constant 0 : i32
    return %c0_i32, %c0_i32_0 : i32, i32
  }
  func.func @transform_1(%arg0: i32, %arg1: i32) -> (i32, i32) {
    %c0_i32 = arith.constant 0 : i32
    %c0_i32_0 = arith.constant 0 : i32
    return %c0_i32, %arg0 : i32, i32
  }
  func.func @transform_2(%arg0: i32, %arg1: i32) -> (i32, i32, i32) {
    %c0_i32 = arith.constant 0 : i32
    %c0_i32_0 = arith.constant 0 : i32
    return %arg1, %c0_i32, %arg0 : i32, i32, i32
  }
  func.func @transform_3(%arg0: i32, %arg1: i32) -> (i32, i32, i32) {
    %c0_i32 = arith.constant 0 : i32
    %c0_i32_0 = arith.constant 0 : i32
    return %arg1, %c0_i32, %arg0 : i32, i32, i32
  }
}

</mosaic_0001>

<bundles_post_ra>
// kernel: yolo_head_forward.1
= control target key start
LH: loop header
LB: loop body
LE: loop exit
PB: predicated region body
PF: predicated region fallthrough
CT: control target
= control target key end

     0   :  { %8 = vsyncpa [#allocation3], 0  ;;  %s853_s0 = inlined_call_operand.vmem [shape: f32[24,4], index: 0, kind: input, shape index: {}]   ;;  %s854_s1 = inlined_call_operand.vmem [shape: f32[2,256], index: 1, kind: input, shape index: {}]   ;;  %s855_s2 = inlined_call_operand.vmem [shape: f32[2,24,256], index: 2, kind: input, shape index: {}]   ;;  %s856_s3 = inlined_call_operand.hbm [shape: f32[2,24,256], index: 3, kind: output, shape index: {}]  }
   0x1   :  { %10 = vsyncpa [#allocation3 + $0x1], 0  ;;  %s715_s12 = smov 0   ;;  %s717_s13 = smov 0  }
   0x2   :  { %s719_s14 = smov 0   ;;  %s721_s15 = smov 0  }
   0x3   :  { %s723_s16 = smov 0   ;;  %s725_s17 = smov 0  }
   0x4 LB: > { %s501_s18 = sadd.s32 4294967295, %s686_s17   ;;  %s502_s19 = sadd.s32 4294967294, %s686_s17   ;;  %s686_s17 = sphi %s725_s17, %s16_s17   ;;  %s682_s16 = sphi %s723_s16, %s863_s16   ;;  %s678_s15 = sphi %s721_s15, %s862_s15   ;;  %s674_s14 = sphi %s719_s14, %s861_s14   ;;  %s670_s13 = sphi %s717_s13, %s860_s13   ;;  %s666_s12 = sphi %s715_s12, %s859_s12  }
   0x5   : > { %s25_s20 = sadd.s32 1, %s682_s16  ;;  %s112_s21 = sadd.s32 1, %s674_s14 }
   0x6   : > { %p26_p0 = scmp.ge.s32.totalorder %s25_s20, 2  ;;  %p122_p1 = scmp.ne.s32.totalorder %s674_s14, %s670_s13 }
   0x7   : > { %p123_p2 = scmp.eq.s32.totalorder %s501_s18, 1  ;;  %p128_p3 = scmp.ne.s32.totalorder %s670_s13, %s666_s12 }
   0x8   : > { %s865_s20 = smov (%p26_p0, %s25_s20), 0  ;;  %p129_p5 = scmp.eq.s32.totalorder %s502_s19, 1 }
   0x9   : > { %p755_p4 = por %p123_p2, %p122_p1  ;;  %s107_s23 = ssub.s32 %s682_s16, %s865_s20 }
   0xa   : > { %p506_p6 = scmp.ge.s32.totalorder %s686_s17, 1  ;;  %p110_p7 = scmp.eq.s32.totalorder %s107_s23, 0 }
   0xb   : > { %p762_p8 = por %p129_p5, %p128_p3  ;;  %p172_p9 = scmp.lt.s32.totalorder %s686_s17, 3 }
   0xc   : > { %s768_s25 = scalar_select %p110_p7, %s674_s14, %s112_s21  }
   0xd   : > { %p173_p10 = pnand %p506_p6, %p172_p9 }
   0xe   : > { %v266_v0 = vld [vmem:[%s853_s0 + $0x10] sm:$0xff] (!%p173_p10)  ;;  %v264_v1 = vld [vmem:[%s853_s0] sm:$0xff] (!%p173_p10)  ;;  %v688_v2 = vmov (!%p173_p10), 2   ;;  %v265_v3 = vld [vmem:[%s853_s0 + $0x8] sm:$0xff] (!%p173_p10)  ;;  %v689_v4 = vmov (!%p173_p10), 3   ;;  %v690_v5 = vmov (!%p173_p10), 0   ;;  %v287_v20 = vlaneseq (!%p173_p10) }
   0xf   : > { %176 = sbr.rel (%p173_p10) target bundleno = 188 (0xbc), region = 32  ;;  %577 = vset.pattern.permute.xlu1 (!%p173_p10), %v688_v2  ;;  %576 = vset.pattern.permute.xlu0 (!%p173_p10), %v688_v2  ;;  %vm268_vm0 = vcmp.gt.f32.partialorder (!%p173_p10), %v265_v3, 0.5  ;;  %vm267_vm1 = vcmp.gt.f32.partialorder (!%p173_p10), %v264_v1, 0.5  ;;  %vm269_vm2 = vcmp.gt.f32.partialorder (!%p173_p10), %v266_v0, 0.5  ;;  %v691_v8 = vmov (!%p173_p10), 1   ;;  %p212_p11 = scmp.lt.s32.totalorder (!%p173_p10), %s678_s15, 1 }
  0x10   : > { %283 = vperm.xlu1 (!%p173_p10), %577, %v266_v0   ;;  %273 = vperm.xlu0 (!%p173_p10), %576, %v264_v1   ;;  %v341_v6 = vsel (!%p173_p10), %vm268_vm0, 1, %v690_v5  ;;  %v340_v7 = vsel (!%p173_p10), %vm267_vm1, 1, %v690_v5  ;;  %v342_v9 = vsel (!%p173_p10), %vm269_vm2, 1, %v690_v5  ;;  %v288_v24 = vshrl.u32 (!%p173_p10), %v287_v20, 7  ;;  %s202_s21 = sand.u32 (!%p173_p10), 1, %s670_s13   ;;  %s514_s27 = smul.u32 (!%p173_p10), 768, %s678_s15 }
  0x11   : > { %v270_v33 = vld [vmem:[%s854_s1] ss:$2 sm:$0x3] (!%p173_p10)  ;;  %v508_v37 = vld [vmem:[%s854_s1 + $0x1] ss:$2 sm:$0x3] (!%p173_p10) }
  0x12   : > { %v289_v31 = vsub.s32 (!%p173_p10), 0, %v288_v24  ;;  %v293_v34 = vsub.s32 (!%p173_p10), 1, %v288_v24  ;;  %s512_s23 = smul.u32 (!%p173_p10), 48, %s202_s21  ;;  %s807_s4 = scalar_lea.sflag (!%p173_p10), [#allocation3], %s202_s21 }
  0x14   : > { %578 = vset.pattern.permute.xlu1 (!%p173_p10), %v689_v4  ;;  %278 = vperm.xlu0 (!%p173_p10), %576, %v265_v3   ;;  %v290_v42 = vrot.slane (!%p173_p10), %v270_v33, %v289_v31  ;;  %v294_v43 = vrot.slane (!%p173_p10), %v270_v33, %v293_v34  ;;  %v321_v44 = vrot.slane (!%p173_p10), %v508_v37, %v289_v31  ;;  %s204_s26 = scalar_lea.vmem (!%p173_p10), [#allocation2], %s512_s23 }
  0x15   : > { %306 = vperm.xlu1 (!%p173_p10), %578, %v264_v1   ;;  %v325_v47 = vrot.slane (!%p173_p10), %v508_v37, %v293_v34  ;;  %s407_s28 = sshll.u32 (!%p173_p10), %s204_s26, 4  ;;  %s798_s28 = int_to_ptr.vmem [resolvable:$true] %s407_s28 }
  0x16   : > { %s213_s5 = scalar_select %p212_p11, %s678_s15, 1 }
  0x17   : > { %s803_s15 = scalar_lea.hbm %s856_s3, %s514_s27 }
  0x18   : > { %579 = vset.pattern.permute.xlu0 %v689_v4  ;;  %s513_s6 = smul.u32 48, %s213_s5  ;;  %s608_s5 = scalar_lea.vmem %s798_s28, 768 }
  0x19   : > { %314 = vperm.xlu1 %578, %v266_v0   ;;  %310 = vperm.xlu0 %579, %v265_v3   ;;  %p609_p12 = scmp.ne.s32.totalorder %s798_s28, %s608_s5 }
  0x1a   : > { %s219_s9 = scalar_lea.vmem %s855_s2, %s513_s6  ;;  %s692_s6 = smov [#allocation2]  }
  0x1b   : > { %v224_v10 = vld [vmem:[%s219_s9 + $0x10] sm:$0xff]  ;;  %v225_v11 = vld [vmem:[%s219_s9 + $0x18] sm:$0xff]  ;;  %v222_v12 = vld [vmem:[%s219_s9] sm:$0xff]  ;;  %p610_p13 = pnand %p609_p12, %p755_p4  ;;  %s612_s7 = sshll.u32 %s692_s6, 4  ;;  %s613_s7 = int_to_ptr.vmem [resolvable:$false] %s612_s7 }
  0x1c   : > { %v230_v13 = vmul.f32 0.5, %v224_v10  ;;  %v223_v14 = vld [vmem:[%s219_s9 + $0x8] sm:$0xff]  ;;  %v231_v15 = vmul.f32 0.5, %v225_v11  ;;  %v228_v16 = vmul.f32 0.5, %v222_v12  ;;  %v226_v18 = vld [vmem:[%s219_s9 + $0x20] sm:$0xff]  ;;  %s614_s8 = scalar_lea.vmem %s613_s7, 1536  ;;  %p615_p1 = scmp.lt.s32.totalorder %s798_s28, %s613_s7 }
  0x1d   : > { %580 = vset.pattern.permute.xlu1 %v691_v8  ;;  %581 = vset.pattern.permute.xlu0 %v691_v8  ;;  %v229_v17 = vmul.f32 0.5, %v223_v14  ;;  %v227_v19 = vld [vmem:[%s219_s9 + $0x28] sm:$0xff]  ;;  %v232_v21 = vmul.f32 0.5, %v226_v18  ;;  %v256_v23 = vmul.f32 1.442695, %v224_v10  ;;  %p611_p0 = pneg %p610_p13  ;;  %p616_p2 = scmp.lt.s32.totalorder %s614_s8, %s608_s5 }
  0x1e   : > { %347 = vperm.xlu0 %581, %v341_v6   ;;  %344 = vperm.xlu1 %580, %v340_v7   ;;  %584 = vtanh.f32 %v230_v13  ;;  %v233_v22 = vmul.f32 0.5, %v227_v19  ;;  %v258_v25 = vmul.f32 1.442695, %v225_v11  ;;  %v252_v28 = vmul.f32 1.442695, %v222_v12 }
  0x1f   : > { %586 = vtanh.f32 %v231_v15  ;;  %v254_v29 = vmul.f32 1.442695, %v223_v14  ;;  %v260_v39 = vmul.f32 1.442695, %v226_v18  ;;  %v262_v41 = vmul.f32 1.442695, %v227_v19  ;;  %p617_p3 = por %p616_p2, %p615_p1 }
  0x20   : > { %588 = vtanh.f32 %v228_v16 }
  0x21   : > { %590 = vtanh.f32 %v229_v17  ;;  %p618_p5 = pnand %p617_p3, %p611_p0 }
  0x22   : > { %583 = vset.pattern.permute.xlu0 %v690_v5  ;;  %350 = vperm.xlu1 %580, %v342_v9   ;;  %592 = vtanh.f32 %v232_v21 }
  0x23   : > { %372 = vperm.xlu0 %583, %v265_v3   ;;  %594 = vtanh.f32 %v233_v22 }
  0x24   : > { %596 = vpow2.f32 %v256_v23 }
  0x25   : > { %598 = vpow2.f32 %v258_v25 }
  0x26   : > { %582 = vset.pattern.permute.xlu1 %v690_v5  ;;  %600 = vpow2.f32 %v252_v28 }
  0x27   : > { %368 = vperm.xlu1 %582, %v264_v1   ;;  %602 = vpow2.f32 %v254_v29 }
  0x28   : > { %v585_v30 = vpop.eup %584  ;;  %604 = vpow2.f32 %v260_v39 }
  0x29   : > { %v587_v32 = vpop.eup %586  ;;  %v242_v45 = vmul.f32 0.5, %v585_v30  ;;  %606 = vpow2.f32 %v262_v41 }
  0x2a   : > { %v589_v36 = vpop.eup %588  ;;  %v243_v46 = vmul.f32 0.5, %v587_v32 }
  0x2b   : > { %376 = vperm.xlu1 %582, %v266_v0   ;;  %v591_v40 = vpop.eup %590  ;;  %v240_v50 = vmul.f32 0.5, %v589_v36  ;;  %v248_v59 = vadd.f32 0.5, %v242_v45 }
  0x2c   : > { %v241_v51 = vmul.f32 0.5, %v591_v40  ;;  %v593_v52 = vpop.eup %592  ;;  %v249_v60 = vadd.f32 0.5, %v243_v46 }
  0x2d   : > { %v595_v53 = vpop.eup %594  ;;  %v246_v62 = vadd.f32 0.5, %v240_v50  ;;  %v244_v0 = vmul.f32 0.5, %v593_v52 }
  0x2e   : > { %v597_v58 = vpop.eup %596  ;;  %v247_v63 = vadd.f32 0.5, %v241_v51  ;;  %v245_v6 = vmul.f32 0.5, %v595_v53 }
  0x2f   : > { %v599_v61 = vpop.eup %598  ;;  %v250_v18 = vadd.f32 0.5, %v244_v0 }
  0x30   : > { %v601_v7 = vpop.eup %600  ;;  %v251_v19 = vadd.f32 0.5, %v245_v6 }
  0x31   : > { %v603_v11 = vpop.eup %602 }
  0x32   : > { %v605_v20 = vpop.eup %604 }
  0x8f   : > { %v784_v26 = vpop.permute.xlu1 %283  ;;  %v274_v27 = vpop.permute.xlu0 %273 }
  0x90   : > { %v297_v1 = vmul.f32 %v290_v42, %v274_v27  ;;  %v298_v2 = vmul.f32 %v294_v43, %v274_v27  ;;  %v607_v27 = vpop.eup %606  ;;  %v301_v31 = vmul.f32 %v290_v42, %v784_v26  ;;  %v302_v32 = vmul.f32 %v294_v43, %v784_v26 }
  0x93   : > { %v279_v35 = vpop.permute.xlu0 %278 }
  0x94   : > { %v307_v38 = vpop.permute.xlu1 %306  ;;  %v299_v54 = vmul.f32 %v290_v42, %v279_v35  ;;  %v300_v55 = vmul.f32 %v294_v43, %v279_v35 }
  0x95   : > { %v328_v3 = vmul.f32 %v321_v44, %v307_v38  ;;  %v329_v8 = vmul.f32 %v325_v47, %v307_v38 }
  0x97   : > { %v334_v16 = vadd.f32 %v328_v3, %v297_v1  ;;  %v335_v21 = vadd.f32 %v329_v8, %v298_v2 }
  0x98   : > { %v315_v48 = vpop.permute.xlu1 %314  ;;  %v311_v49 = vpop.permute.xlu0 %310 }
  0x99   : > { %v330_v56 = vmul.f32 %v321_v44, %v311_v49  ;;  %v331_v57 = vmul.f32 %v325_v47, %v311_v49  ;;  %v332_v22 = vmul.f32 %v321_v44, %v315_v48  ;;  %v333_v28 = vmul.f32 %v325_v47, %v315_v48 }
  0x9b   : > { %v336_v9 = vadd.f32 %v330_v56, %v299_v54  ;;  %v337_v10 = vadd.f32 %v331_v57, %v300_v55  ;;  %v338_v38 = vadd.f32 %v332_v22, %v301_v31  ;;  %v339_v39 = vadd.f32 %v333_v28, %v302_v32 }
  0x9d   : > { %v348_v4 = vpop.permute.xlu0 %347  ;;  %v345_v5 = vpop.permute.xlu1 %344 }
  0x9e   : > { %vm353_vm3 = vcmp.eq.s32.totalorder %v348_v4, 1  ;;  %vm352_vm4 = vcmp.eq.s32.totalorder %v345_v5, 1 }
  0x9f   : > { %v357_v12 = vsel %vm353_vm3, %v597_v58, %v248_v59  ;;  %v358_v13 = vsel %vm353_vm3, %v599_v61, %v249_v60  ;;  %v355_v23 = vsel %vm352_vm4, %v601_v7, %v246_v62  ;;  %v356_v24 = vsel %vm352_vm4, %v603_v11, %v247_v63 }
  0xa0   : > { %v363_v14 = vadd.f32 %v357_v12, %v336_v9  ;;  %v364_v15 = vadd.f32 %v358_v13, %v337_v10  ;;  %v361_v33 = vadd.f32 %v355_v23, %v334_v16  ;;  %v362_v34 = vadd.f32 %v356_v24, %v335_v21 }
  0xa1   : > { %v351_v17 = vpop.permute.xlu1 %350 }
  0xa2   : > { %v373_v25 = vpop.permute.xlu0 %372  ;;  %vm354_vm5 = vcmp.eq.s32.totalorder %v351_v17, 1 }
  0xa3   : > { %v381_v29 = vmul.f32 %v373_v25, %v363_v14  ;;  %v382_v30 = vmul.f32 %v373_v25, %v364_v15  ;;  %v359_v35 = vsel %vm354_vm5, %v605_v20, %v250_v18  ;;  %v360_v36 = vsel %vm354_vm5, %v607_v27, %v251_v19 }
  0xa4   : > { %v365_v42 = vadd.f32 %v359_v35, %v338_v38  ;;  %v366_v26 = vadd.f32 %v360_v36, %v339_v39 }
  0xa5   : > { %387 = vst [vmem:[%s204_s26 + $0x10] sm:$0xff] %v381_v29  ;;  %388 = vst [vmem:[%s204_s26 + $0x18] sm:$0xff] %v382_v30 }
  0xa6   : > { %v369_v37 = vpop.permute.xlu1 %368 }
  0xa7   : > { %v379_v40 = vmul.f32 %v369_v37, %v361_v33  ;;  %v380_v41 = vmul.f32 %v369_v37, %v362_v34 }
  0xa9   : > { %385 = vst [vmem:[%s204_s26] sm:$0xff] %v379_v40  ;;  %386 = vst [vmem:[%s204_s26 + $0x8] sm:$0xff] %v380_v41 }
  0xaa   : > { %v377_v43 = vpop.permute.xlu1 %376 }
  0xab   : > { %v383_v44 = vmul.f32 %v377_v43, %v365_v42  ;;  %v384_v45 = vmul.f32 %v377_v43, %v366_v26 }
  0xad   : > { %389 = vst [vmem:[%s204_s26 + $0x20] sm:$0xff] %v383_v44  ;;  %390 = vst [vmem:[%s204_s26 + $0x28] sm:$0xff] %v384_v45 }
  0xae   : > { %621 = shalt.err (!%p618_p5)
}
  0xaf   : > { %s622_s9 = scalar_lea.hbm %s803_s15, 768  ;;  %s626_s18 = scalar_lea.hbm %s856_s3, 1536 }
  0xb0   : > { %p623_p6 = scmp.ne.s32.totalorder %s803_s15, %s622_s9  ;;  %p627_p10 = scmp.lt.u32.totalorder %s803_s15, %s856_s3 }
  0xb1   : > { %p628_p11 = scmp.lt.u32.totalorder %s626_s18, %s622_s9  ;;  %p630_p13 = scmp.lt.u32.totalorder %s622_s9, %s803_s15 }
  0xb2   : > { %p624_p7 = pnand %p623_p6, %p755_p4 }
  0xb3   : > { %p629_p12 = por %p628_p11, %p627_p10 }
  0xb4   : > { %p625_p9 = pneg %p624_p7 }
  0xb5   : > { %p631_p0 = por %p630_p13, %p629_p12 }
  0xb7   : > { %p632_p1 = pnand %p631_p0, %p625_p9 }
  0xb9   : > { %635 = shalt.err (!%p632_p1)
}
  0xba   : > { %s693_s23 = smov 256   ;;  %s694_s26 = smov 16  }
  0xbb   : > { %515 = dma.vmem_to_hbm [thread:$0]  (%p755_p4), %s798_s28, 768, %s803_s15, %s807_s4, %s693_s23, %s693_s23, %s694_s26  }
  0xbc PF: > { %p521_p2 = scmp.ge.s32.totalorder %s686_s17, 2  ;;  %s422_s27 = sand.u32 1, %s666_s12  }
  0xbd   : > { %s423_s29 = scalar_lea.sflag [#allocation3], %s422_s27 }
  0xbe   : > { %p518_p3 = pnand %p521_p2, %p762_p8 }
  0xc0   : > { %661 = dma.done.wait (!%p518_p3), %s423_s29, 768  }
  0xc1   : > { %663 = vsyncadd (!%p518_p3), %s423_s29, 4294966528  ;;  %s16_s17 = sadd.s32 1, %s686_s17   ;;  %s859_s12 = smov %s670_s13 }
  0xc2   : > { %p13_p5 = scmp.ge.s32.totalorder %s16_s17, 4   ;;  %s860_s13 = smov %s674_s14 }
  0xc3   : > { %s861_s14 = smov %s768_s25  ;;  %s862_s15 = smov %s682_s16 }
  0xc4   : > { %s863_s16 = smov %s865_s20  ;;  %15 = sbr.rel (!%p13_p5) target bundleno = 4 (0x4), region = 71 }
  0xcb   :  { %428 = vsyncpa [#allocation3], 1 }
  0xcc   :  { %430 = vsyncpa [#allocation3 + $0x1], 1 }

</bundles_post_ra>
